<compile_context>
chip_gen: v7x
topology: tpu7x:2x2x1
jax: 0.10.0
libtpu: 0.0.40
codegen_flags: <defaults>
</compile_context>

<pallas_src>
import functools
import math

import jax
import jax.numpy as jnp
from jax.experimental import pallas as pl
from jax.experimental.pallas import tpu as pltpu


def _round_up(a, b):
    return (a + b - 1) // b * b


def _prop_tiling(n, row_tile, k_tile):
    """Padded node count and (row, k) tiles for propagate. Tiles are multiples of
    128 and evenly divide the padded extent, so the contraction never reads a
    partial (garbage) block."""
    n128 = _round_up(n, 128)
    tr = min(_round_up(row_tile, 128), n128)
    tk = min(_round_up(k_tile, 128), n128)
    lcm = tr * tk // math.gcd(tr, tk)
    n_pad = _round_up(n128, lcm)
    return n_pad, tr, tk


def _divisor_tile(want, total):
    """Largest multiple of 128 <= want that divides `total` (total % 128 == 0)."""
    t = max(128, min(_round_up(want, 128), total))
    while total % t:
        t -= 128
    return t


# --------------------------------------------------------------------------- #
# Kernel 1: fused per-node features.
#   out lanes [0, z)  = linear1(x)                         (mu branch)
#   out lanes [z, 2z) = 1.8 * l2_normalize(linear2(x))
#   out lanes [2z, P) = 0                                  (lane padding)
# The diag(D^-1/2) pre-scaling of the propagation is folded in here.
# --------------------------------------------------------------------------- #
def feature_kernel(x_ref, w_ref, b_ref, dinv_ref, out_ref, *, z, scale):
    x = x_ref[...].astype(jnp.bfloat16)                               # [tr, F_in] bf16
    h = jnp.dot(x, w_ref[...], preferred_element_type=jnp.float32)    # one P-wide MXU matmul
    h = h + b_ref[...]                                                # f32 [tr, P]

    lane = jax.lax.broadcasted_iota(jnp.int32, h.shape, 1)
    norm_mask = (lane >= z) & (lane < 2 * z)
    nrm2 = jnp.sum(jnp.where(norm_mask, h * h, 0.0), axis=1, keepdims=True)
    # torch F.normalize: x / max(||x||, 1e-12)  ==  x * rsqrt(max(||x||^2, 1e-24))
    inv = jnp.float32(scale) * jax.lax.rsqrt(jnp.maximum(nrm2, jnp.float32(1e-24)))
    h = jnp.where(norm_mask, h * inv, h)

    out_ref[...] = (h * dinv_ref[...]).astype(out_ref.dtype)          # diag pre-scale, bf16 slab


def encode_features(x_pad, w_fused, b_fused, dinv_col, *, z, scale, row_tile):
    n_pad, f_in = x_pad.shape
    p = w_fused.shape[1]
    grid = (n_pad // row_tile,)
    full = lambda a: pl.BlockSpec(a.shape, lambda i: (0,) * a.ndim)

    return pl.pallas_call(
        functools.partial(feature_kernel, z=z, scale=scale),
        grid=grid,
        out_shape=jax.ShapeDtypeStruct((n_pad, p), jnp.bfloat16),
        in_specs=[
            pl.BlockSpec((row_tile, f_in), lambda i: (i, 0)),
            full(w_fused),                                   # grid-invariant (tiny) weights
            full(b_fused),
            pl.BlockSpec((row_tile, 1), lambda i: (i, 0)),   # D^-1/2 per node
        ],
        out_specs=pl.BlockSpec((row_tile, p), lambda i: (i, 0)),
        compiler_params=pltpu.CompilerParams(
            dimension_semantics=("parallel",),
            vmem_limit_bytes=32 * 1024 * 1024,
        ),
    )(x_pad, w_fused, b_fused, dinv_col)


# --------------------------------------------------------------------------- #
# Kernel 2: APPNP(K=1, alpha=0) for BOTH branches — K-tiled (A+I) @ slab with a
# VMEM f32 accumulator, int8 adjacency stream, diag(D^-1/2) post-scale epilogue.
# --------------------------------------------------------------------------- #
def propagate_kernel(adj_ref, feat_ref, dinv_ref, out_ref, acc_ref):
    k = pl.program_id(1)

    @pl.when(k == 0)
    def _():
        acc_ref[...] = jnp.zeros_like(acc_ref)

    # int8 binary/count (A+I) tile -> bf16 (values are small integers, exact in bf16),
    # bf16 x bf16 on the MXU, f32 accumulation.
    a = adj_ref[...].astype(jnp.bfloat16)
    acc_ref[...] += jnp.dot(a, feat_ref[...], preferred_element_type=jnp.float32)

    @pl.when(k == pl.num_programs(1) - 1)
    def _():
        out_ref[...] = (acc_ref[...] * dinv_ref[...]).astype(out_ref.dtype)


def propagate(adj_plus_i, feats, dinv_col, *, row_tile, k_tile):
    n_pad = adj_plus_i.shape[0]
    p = feats.shape[1]
    grid = (n_pad // row_tile, n_pad // k_tile)

    # TODO(synk): on v7x store (A+I) as fp8 / on v6e-v5e as int8 with a native int-MXU dot
    # instead of the in-kernel bf16 cast, once the narrower MXU paths are needed.
    return pl.pallas_call(
        propagate_kernel,
        grid=grid,
        out_shape=jax.ShapeDtypeStruct((n_pad, p), jnp.float32),
        in_specs=[
            pl.BlockSpec((row_tile, k_tile), lambda i, k: (i, k)),   # int8 (A+I) tile
            pl.BlockSpec((k_tile, p), lambda i, k: (k, 0)),          # bf16 slab K-slice
            pl.BlockSpec((row_tile, 1), lambda i, k: (i, 0)),        # D^-1/2 per dst row
        ],
        out_specs=pl.BlockSpec((row_tile, p), lambda i, k: (i, 0)),
        scratch_shapes=[pltpu.VMEM((row_tile, p), jnp.float32)],
        compiler_params=pltpu.CompilerParams(
            dimension_semantics=("parallel", "arbitrary"),
            vmem_limit_bytes=32 * 1024 * 1024,
        ),
    )(adj_plus_i, feats, dinv_col)


# --------------------------------------------------------------------------- #
# Graph / parameter helpers (plain JAX preprocessing).
# --------------------------------------------------------------------------- #
def build_graph(edge_index, num_nodes, n_pad):
    """(A+I) as an exact int8 count matrix (zero-padded to n_pad) and D^-1/2 per node.

    Matches PyG gcn_norm with add_self_loops=True: duplicate edges are counted, a
    self-loop is added only to nodes without one, deg = in-degree incl. self-loops.
    """
    # TODO(synk): this edge_index scatter has no clean Pallas equivalent; it stays in XLA.
    src = edge_index[0]
    dst = edge_index[1]
    e = src.shape[0]

    # Scatter directly into int8 — no f32 N x N intermediate.
    # (Counts >127 duplicate edges between one pair would overflow int8.)
    adj = jnp.zeros((n_pad, n_pad), jnp.int8)
    adj = adj.at[dst, src].add(jnp.ones((e,), jnp.int8))

    has_self = jnp.zeros((num_nodes,), jnp.int32).at[dst].max(
        jnp.where(src == dst, 1, 0))
    add_self = 1 - has_self
    idx = jnp.arange(num_nodes)
    adj = adj.at[idx, idx].add(add_self.astype(jnp.int8))

    in_deg = jnp.zeros((num_nodes,), jnp.float32).at[dst].add(1.0)
    deg = in_deg + add_self.astype(jnp.float32)
    dinv = jax.lax.rsqrt(jnp.maximum(deg, 1.0))
    dinv_col = jnp.ones((n_pad, 1), jnp.float32).at[:num_nodes, 0].set(dinv)
    return adj, dinv_col


def init_vgnae_params(key, in_channels, z_dim):
    """Deterministic synthetic parameters matching VGNAEEncoder's Linear shapes."""
    k1, k2, k3, k4 = jax.random.split(key, 4)
    bound = float(in_channels) ** -0.5
    w1 = jax.random.uniform(k1, (in_channels, z_dim), jnp.float32, -bound, bound)
    b1 = jax.random.uniform(k2, (1, z_dim), jnp.float32, -bound, bound)
    w2 = jax.random.uniform(k3, (in_channels, z_dim), jnp.float32, -bound, bound)
    b2 = jax.random.uniform(k4, (1, z_dim), jnp.float32, -bound, bound)
    return dict(w1=w1, b1=b1, w2=w2, b2=b2)


def vgnae_encoder_forward(params, x, edge_index, *,
                          prop_row_tile=1024, prop_k_tile=1024,
                          feat_row_tile=512, scale=1.8):
    n, f_in = x.shape
    z = params["w1"].shape[1]
    p = _round_up(2 * z, 128)                       # lane-dense slab width

    n_pad, tr, tk = _prop_tiling(n, prop_row_tile, prop_k_tile)
    ft = _divisor_tile(feat_row_tile, n_pad)        # feature kernel's own row tile

    # Fused [w1 | w2 | 0-pad] weights / [b1 | b2 | 0] bias -> one P-wide matmul per tile.
    w_fused = jnp.zeros((f_in, p), jnp.float32)
    w_fused = w_fused.at[:, :z].set(params["w1"]).at[:, z:2 * z].set(params["w2"])
    w_fused = w_fused.astype(jnp.bfloat16)
    b_fused = jnp.zeros((1, p), jnp.float32)
    b_fused = b_fused.at[:, :z].set(params["b1"].reshape(1, z))
    b_fused = b_fused.at[:, z:2 * z].set(params["b2"].reshape(1, z))

    adj, dinv_col = build_graph(edge_index, n, n_pad)
    x_pad = jnp.zeros((n_pad, f_in), jnp.bfloat16).at[:n].set(x.astype(jnp.bfloat16))

    feats = encode_features(x_pad, w_fused, b_fused, dinv_col,
                            z=z, scale=scale, row_tile=ft)            # [n_pad, P] bf16
    prop = propagate(adj, feats, dinv_col, row_tile=tr, k_tile=tk)     # [n_pad, P] f32

    x_mu = prop[:n, :z]            # x_ = propagate(linear1(x))
    x_out = prop[:n, z:2 * z]      # x  = propagate(1.8 * normalize(linear2(x)))
    return x_out, x_mu             # matches the module's `return (x, x_)`


def _reference_forward(params, x, edge_index, scale=1.8):
    """Pure-JAX f32 reference (dense gcn_norm + two linears + normalize)."""
    n = x.shape[0]
    src, dst = edge_index[0], edge_index[1]
    a = jnp.zeros((n, n), jnp.float32).at[dst, src].add(1.0)
    idx = jnp.arange(n)
    has_self = a[idx, idx] > 0
    a = a.at[idx, idx].add(jnp.where(has_self, 0.0, 1.0))
    dinv = jax.lax.rsqrt(jnp.maximum(a.sum(axis=1), 1.0))
    an = a * dinv[:, None] * dinv[None, :]
    h1 = x @ params["w1"] + params["b1"].reshape(1, -1)
    h2 = x @ params["w2"] + params["b2"].reshape(1, -1)
    nrm = jnp.maximum(jnp.linalg.norm(h2, axis=1, keepdims=True), 1e-12)
    h2 = h2 / nrm * scale
    return an @ h2, an @ h1


if __name__ == "__main__":
    key = jax.random.PRNGKey(0)
    k_feat, k_edge, k_param = jax.random.split(key, 3)

    num_nodes = 256
    in_channels = 32
    z_dim = 32
    num_edges = 512

    x = jax.random.normal(k_feat, (num_nodes, in_channels), jnp.float32)
    edge_index = jax.random.randint(k_edge, (2, num_edges), 0, num_nodes,
                                    dtype=jnp.int32)
    params = init_vgnae_params(k_param, in_channels, z_dim)

    # 128-wide tiles exercise the pipelined row grid AND the K-reduction accumulator
    # path (grid (2, 2)) even at this toy size.
    x_out, x_mu = vgnae_encoder_forward(params, x, edge_index,
                                        prop_row_tile=128, prop_k_tile=128,
                                        feat_row_tile=128)
    x_out = jax.block_until_ready(x_out)
    x_mu = jax.block_until_ready(x_mu)

    assert x_out.shape == (num_nodes, z_dim)
    assert x_mu.shape == (num_nodes, z_dim)
    assert bool(jnp.all(jnp.isfinite(x_out))) and bool(jnp.all(jnp.isfinite(x_mu)))

    ref_out, ref_mu = _reference_forward(params, x, edge_index)
    err_out = float(jnp.max(jnp.abs(x_out - ref_out))) / (float(jnp.max(jnp.abs(ref_out))) + 1e-6)
    err_mu = float(jnp.max(jnp.abs(x_mu - ref_mu))) / (float(jnp.max(jnp.abs(ref_mu))) + 1e-6)
    assert err_out < 5e-2 and err_mu < 5e-2, (err_out, err_mu)

    print("KERNEL_OK")
</pallas_src>

<mosaic_0001>
module attributes {stable_mosaic.version = 11 : i64} {
  func.func @feature_kernel(%arg0: i32, %arg1: memref<128x32xbf16, #tpu.memory_space<vmem>>, %arg2: memref<32x128xbf16, #tpu.memory_space<vmem>>, %arg3: memref<1x128xf32, #tpu.memory_space<vmem>>, %arg4: memref<128x1xf32, #tpu.memory_space<vmem>>, %arg5: memref<128x128xbf16, #tpu.memory_space<vmem>>) attributes {dimension_semantics = [#tpu.dimension_semantics<parallel>], iteration_bounds = array<i64: 2>, scalar_prefetch = 0 : i64, scratch_operands = 0 : i64, tpu.core_type = #tpu.core_type<tc>, window_params = [{transform_indices = @transform_0, window_bounds = array<i64: 128, 32>}, {pipeline_mode = #tpu.pipeline_mode<synchronous>, transform_indices = @transform_1, window_bounds = array<i64: 32, 128>}, {pipeline_mode = #tpu.pipeline_mode<synchronous>, transform_indices = @transform_2, window_bounds = array<i64: 1, 128>}, {transform_indices = @transform_3, window_bounds = array<i64: 128, 1>}, {transform_indices = @transform_4, window_bounds = array<i64: 128, 128>}]} {
    %c0 = arith.constant 0 : index
    %c0_0 = arith.constant 0 : index
    %0 = vector.load %arg1[%c0, %c0_0] : memref<128x32xbf16, #tpu.memory_space<vmem>>, vector<128x32xbf16>
    %c0_1 = arith.constant 0 : index
    %c0_2 = arith.constant 0 : index
    %1 = vector.load %arg2[%c0_1, %c0_2] : memref<32x128xbf16, #tpu.memory_space<vmem>>, vector<32x128xbf16>
    %cst = arith.constant dense<0.000000e+00> : vector<128x128xf32>
    %2 = tpu.matmul %0, %1, %cst {dimension_numbers = #tpu.dot_dimension_numbers<[1], [0], [0], [1], [0, 0, 1, 1], [], []>} : vector<128x32xbf16>, vector<32x128xbf16>, vector<128x128xf32> -> vector<128x128xf32>
    %c0_3 = arith.constant 0 : index
    %c0_4 = arith.constant 0 : index
    %3 = vector.load %arg3[%c0_3, %c0_4] : memref<1x128xf32, #tpu.memory_space<vmem>>, vector<1x128xf32>
    %4 = vector.broadcast %3 : vector<1x128xf32> to vector<128x128xf32>
    %5 = arith.addf %2, %4 : vector<128x128xf32>
    %6 = tpu.iota {dimensions = array<i32: 1>} : vector<128x128xi32>
    %c32_i32 = arith.constant 32 : i32
    %7 = vector.broadcast %c32_i32 : i32 to vector<128x128xi32>
    %8 = arith.cmpi sge, %6, %7 : vector<128x128xi32>
    %c64_i32 = arith.constant 64 : i32
    %9 = vector.broadcast %c64_i32 : i32 to vector<128x128xi32>
    %10 = arith.cmpi slt, %6, %9 : vector<128x128xi32>
    %11 = arith.andi %8, %10 : vector<128x128xi1>
    %12 = arith.mulf %5, %5 : vector<128x128xf32>
    %cst_5 = arith.constant 0.000000e+00 : f32
    %13 = vector.broadcast %cst_5 : f32 to vector<128x128xf32>
    %14 = arith.select %11, %12, %13 : vector<128x128xi1>, vector<128x128xf32>
    %cst_6 = arith.constant dense<0.000000e+00> : vector<128xf32>
    %15 = vector.multi_reduction <add>, %14, %cst_6 [1] : vector<128x128xf32> to vector<128xf32>
    %16 = vector.shape_cast %15 : vector<128xf32> to vector<128x1xf32>
    %cst_7 = arith.constant 1.000000e-24 : f32
    %17 = vector.broadcast %cst_7 : f32 to vector<128x1xf32>
    %18 = arith.maximumf %16, %17 : vector<128x1xf32>
    %19 = math.rsqrt %18 : vector<128x1xf32>
    %cst_8 = arith.constant 1.800000e+00 : f32
    %20 = vector.broadcast %cst_8 : f32 to vector<128x1xf32>
    %21 = arith.mulf %20, %19 : vector<128x1xf32>
    %22 = vector.broadcast %21 : vector<128x1xf32> to vector<128x128xf32>
    %23 = arith.mulf %5, %22 : vector<128x128xf32>
    %24 = arith.select %11, %23, %5 : vector<128x128xi1>, vector<128x128xf32>
    %c0_9 = arith.constant 0 : index
    %c0_10 = arith.constant 0 : index
    %25 = vector.load %arg4[%c0_9, %c0_10] : memref<128x1xf32, #tpu.memory_space<vmem>>, vector<128x1xf32>
    %26 = vector.broadcast %25 : vector<128x1xf32> to vector<128x128xf32>
    %27 = arith.mulf %24, %26 : vector<128x128xf32>
    %28 = arith.truncf %27 : vector<128x128xf32> to vector<128x128xbf16>
    %c0_11 = arith.constant 0 : index
    %c0_12 = arith.constant 0 : index
    %29 = vector.load %arg5[%c0_11, %c0_12] : memref<128x128xbf16, #tpu.memory_space<vmem>>, vector<128x128xbf16>
    tpu.vector_store %arg5[%c0_11, %c0_12], %28 {strides = array<i32>} : memref<128x128xbf16, #tpu.memory_space<vmem>>, vector<128x128xbf16>,
    return
  }
  func.func @transform_0(%arg0: i32) -> (i32, i32) {
    %c0_i32 = arith.constant 0 : i32
    %c0_i32_0 = arith.constant 0 : i32
    return %arg0, %c0_i32 : i32, i32
  }
  func.func @transform_1(%arg0: i32) -> (i32, i32) {
    %c0_i32 = arith.constant 0 : i32
    %c0_i32_0 = arith.constant 0 : i32
    %c0_i32_1 = arith.constant 0 : i32
    return %c0_i32, %c0_i32_0 : i32, i32
  }
  func.func @transform_2(%arg0: i32) -> (i32, i32) {
    %c0_i32 = arith.constant 0 : i32
    %c0_i32_0 = arith.constant 0 : i32
    %c0_i32_1 = arith.constant 0 : i32
    return %c0_i32, %c0_i32_0 : i32, i32
  }
  func.func @transform_3(%arg0: i32) -> (i32, i32) {
    %c0_i32 = arith.constant 0 : i32
    %c0_i32_0 = arith.constant 0 : i32
    return %arg0, %c0_i32 : i32, i32
  }
  func.func @transform_4(%arg0: i32) -> (i32, i32) {
    %c0_i32 = arith.constant 0 : i32
    %c0_i32_0 = arith.constant 0 : i32
    return %arg0, %c0_i32 : i32, i32
  }
}

</mosaic_0001>

<bundles_post_ra>
// kernel: tpu_custom_call.1
= control target key start
LH: loop header
LB: loop body
LE: loop exit
PB: predicated region body
PF: predicated region fallthrough
CT: control target
= control target key end

     0   :  { %9 = vsyncpa [#allocation3], 0  ;;  %s1557_s0 = inlined_call_operand.vmem [shape: bf16[256,32], index: 0, kind: input, shape index: {}]   ;;  %s1558_s1 = inlined_call_operand.vmem [shape: bf16[32,128], index: 1, kind: input, shape index: {}]   ;;  %s1559_s2 = inlined_call_operand.vmem [shape: f32[1,128], index: 2, kind: input, shape index: {}]   ;;  %s1560_s3 = inlined_call_operand.vmem [shape: f32[256,1], index: 3, kind: input, shape index: {}]   ;;  %s1561_s4 = inlined_call_operand.hbm [shape: bf16[256,128], index: 4, kind: output, shape index: {}]  }
   0x1   :  { %11 = vsyncpa [#allocation3 + $0x1], 0  ;;  %s1178_s15 = smov 0   ;;  %s1180_s16 = smov 0  }
   0x2   :  { %s1182_s17 = smov 0   ;;  %s1184_s18 = smov 0  }
   0x3 LB: > { %s1199_s19 = sadd.s32 4294967295, %s1147_s18   ;;  %s852_s20 = sadd.s32 4294967294, %s1147_s18   ;;  %s1147_s18 = sphi %s1184_s18, %s1569_s18   ;;  %s1143_s17 = sphi %s1182_s17, %s1568_s17   ;;  %s1139_s16 = sphi %s1180_s16, %s1567_s16   ;;  %s1135_s15 = sphi %s1178_s15, %s1566_s15  }
   0x4   : > { %s1203_s21 = sadd.s32 1, %s1147_s18   ;;  %s118_s22 = sadd.s32 1, %s1143_s17 }
   0x5   : > { %s115_s23 = ssub.s32 %s1147_s18, %s1203_s21  ;;  %p128_p0 = scmp.ne.s32.totalorder %s1143_s17, %s1139_s16 }
   0x6   : > { %p116_p1 = scmp.eq.s32.totalorder %s115_s23, 0  ;;  %p129_p2 = scmp.eq.s32.totalorder %s1199_s19, 1 }
   0x7   : > { %p134_p3 = scmp.ne.s32.totalorder %s1139_s16, %s1135_s15  ;;  %p135_p4 = scmp.eq.s32.totalorder %s852_s20, 1 }
   0x8   : > { %s1214_s24 = scalar_select %p116_p1, %s1143_s17, %s118_s22  }
   0x9   : > { %p1216_p5 = por %p129_p2, %p128_p0  ;;  %p1220_p6 = por %p135_p4, %p134_p3 }
   0xa   : > { %p855_p7 = scmp.ge.s32.totalorder %s1147_s18, 1  ;;  %p177_p8 = scmp.lt.s32.totalorder %s1147_s18, 3 }
   0xc   : > { %p178_p9 = pnand %p855_p7, %p177_p8 }
   0xd   : > { %v1043_v0 = vld [vmem:[%s1558_s1] sm:$0xff] (!%p178_p9)   ;;  %s857_s29 = sshll.u32 (!%p178_p9), %s1199_s19, 4  ;;  %v1044_v1 = vld [vmem:[%s1558_s1 + $0x8] sm:$0xff] (!%p178_p9)   ;;  %v1149_v2 = vmov (!%p178_p9), 0   ;;  %vm301_vm0 = vcmask (!%p178_p9), 261120   ;;  %v423_v25 = vlaneseq (!%p178_p9)  ;;  %s205_s22 = sand.u32 (!%p178_p9), 1, %s1139_s16  }
   0xe   : > { %181 = sbr.rel (%p178_p9) target bundleno = 451 (0x1c3), region = 36  ;;  %p209_p10 = scmp.lt.s32.totalorder (!%p178_p9), %s857_s29, 31  ;;  %975 = vmatprep.subr.bf16.mxu0 (!%p178_p9), %v1043_v0  ;;  %995 = vmatprep.subr.bf16.mxu1 (!%p178_p9), %v1043_v0  ;;  %v1266_v27 = vld [vmem:[%s1559_s2] ss:$0 sm:$0xff] (!%p178_p9) }
   0xf   : > { %976 = vmatpush3.bf16.msra.mxu0 (!%p178_p9), %v1043_v0  ;;  %997 = vmatpush3.bf16.msra.mxu1 (!%p178_p9), %v1043_v0  ;;  %v424_v26 = vand.u32 (!%p178_p9), 127, %v423_v25  ;;  %s856_s23 = sshll.u32 (!%p178_p9), %s205_s22, 6  ;;  %s917_s28 = sshll.u32 (!%p178_p9), %s1199_s19, 10 }
  0x10   : > { %977 = vmatprep.subr.bf16.mxu0 (!%p178_p9), %v1044_v1  ;;  %996 = vmatprep.subr.bf16.mxu1 (!%p178_p9), %v1044_v1  ;;  %s1438_s27 = scalar_lea.vmem (!%p178_p9), [#allocation2], %s856_s23  ;;  %s1516_s19 = scalar_lea.sflag (!%p178_p9), [#allocation3], %s205_s22 }
  0x11   : > { %1042 = vset.pattern.permute.xlu1 (!%p178_p9), %v1149_v2  ;;  %1041 = vset.pattern.permute.xlu0 (!%p178_p9), %v1149_v2  ;;  %vm425_vm1 = vcmp.ge.s32.totalorder (!%p178_p9), %v424_v26, 32  ;;  %vm426_vm2 = vcmp.lt.s32.totalorder (!%p178_p9), %v424_v26, 64  ;;  %s1150_s8 = smov (!%p178_p9), [#allocation2]  }
  0x12   : > { %vm1277_vm3 = vmand (!%p178_p9), %vm425_vm1, %vm426_vm2 }
  0x13   : > { %978 = vmatpush3.bf16.msra.mxu0 (!%p178_p9), %v1044_v1  ;;  %998 = vmatpush3.bf16.msra.mxu1 (!%p178_p9), %v1044_v1 }
  0x15   : > { %s1571_s29 = smov (!%p209_p10, %s857_s29), 31 }
  0x16   : > { %s858_s6 = sshll.u32 %s1571_s29, 2  ;;  %s860_s10 = sshll.u32 %s1571_s29, 3 }
  0x17   : > { %s212_s9 = scalar_lea.vmem %s1557_s0, %s858_s6  ;;  %s1243_s13 = scalar_lea.vmem %s1560_s3, %s860_s10 }
  0x18   : > { %v1045_v3 = vld [vmem:[%s212_s9] sm:$0xff]   ;;  %v1047_v5 = vld [vmem:[%s212_s9 + $0x8] sm:$0xff]   ;;  %v1049_v7 = vld [vmem:[%s212_s9 + $0x10] sm:$0xff]   ;;  %s778_s29 = sshll.u32 %s1438_s27, 4  ;;  %s1509_s6 = scalar_lea.hbm %s1561_s4, %s917_s28  ;;  %s1511_s29 = int_to_ptr.vmem [resolvable:$true] %s778_s29 }
  0x19   : > { %v1046_v4 = vld [vmem:[%s212_s9 + $0x20] sm:$0xff]   ;;  %979 = vmatprep.mubr.msk.bf16.mxu0 %vm301_vm0, %v1045_v3  ;;  %v1048_v6 = vld [vmem:[%s212_s9 + $0x28] sm:$0xff]   ;;  %v1051_v8 = vld [vmem:[%s212_s9 + $0x30] sm:$0xff]   ;;  %s1085_s7 = scalar_lea.vmem %s1511_s29, 1024 }
  0x1a   : > { %987 = vmatprep.mubr.msk.bf16.mxu1 %vm301_vm0, %v1046_v4  ;;  %980 = vmatmul.mubr.msk.bf16.vlgmr.msra.gmra.mrb[0].mxu0 %vm301_vm0, %v1047_v5  ;;  %v1050_v9 = vld [vmem:[%s212_s9 + $0x18] sm:$0xff]   ;;  %v573_v10 = vld [vmem:[%s1243_s13 + $0x8] sm:$0xff]  ;;  %v574_v12 = vld [vmem:[%s1243_s13 + $0x10] sm:$0xff]  ;;  %p1086_p11 = scmp.ne.s32.totalorder %s1511_s29, %s1085_s7 }
  0x1b   : > { %988 = vmatmul.mubr.msk.bf16.vlgmr.msra.gmra.mrb[0].mxu1 %vm301_vm0, %v1048_v6  ;;  %983 = vmatprep.mubr.msk.bf16.mxu0 %vm301_vm0, %v1049_v7  ;;  %v1052_v11 = vld [vmem:[%s212_s9 + $0x38] sm:$0xff]   ;;  %v572_v13 = vld [vmem:[%s1243_s13] sm:$0xff]  ;;  %v581_v14 = vld [vmem:[%s1243_s13 + $0x48] sm:$0xff]  ;;  %s1089_s9 = sshll.u32 %s1150_s8, 4  ;;  %s1090_s9 = int_to_ptr.vmem [resolvable:$false] %s1089_s9 }
  0x1c   : > { %991 = vmatprep.mubr.msk.bf16.mxu1 %vm301_vm0, %v1051_v8  ;;  %595 = vperm.xlu1 %1042, %v573_v10   ;;  %v575_v15 = vld [vmem:[%s1243_s13 + $0x18] sm:$0xff]  ;;  %v576_v17 = vld [vmem:[%s1243_s13 + $0x20] sm:$0xff]  ;;  %v585_v18 = vld [vmem:[%s1243_s13 + $0x68] sm:$0xff]  ;;  %p1087_p12 = pnand %p1086_p11, %p1216_p5  ;;  %s1091_s10 = scalar_lea.vmem %s1090_s9, 2048 }
  0x1d   : > { %590 = vperm.xlu0 %1041, %v572_v13   ;;  %v583_v16 = vld [vmem:[%s1243_s13 + $0x58] sm:$0xff]  ;;  %v577_v19 = vld [vmem:[%s1243_s13 + $0x28] sm:$0xff]  ;;  %v578_v20 = vld [vmem:[%s1243_s13 + $0x30] sm:$0xff]  ;;  %p1092_p0 = scmp.lt.s32.totalorder %s1511_s29, %s1090_s9  ;;  %p1093_p1 = scmp.lt.s32.totalorder %s1091_s10, %s1085_s7 }
  0x1e   : > { %v579_v21 = vld [vmem:[%s1243_s13 + $0x38] sm:$0xff]  ;;  %v580_v22 = vld [vmem:[%s1243_s13 + $0x40] sm:$0xff]  ;;  %v582_v23 = vld [vmem:[%s1243_s13 + $0x50] sm:$0xff]  ;;  %p1088_p13 = pneg %p1087_p12 }
  0x1f   : > { %v584_v24 = vld [vmem:[%s1243_s13 + $0x60] sm:$0xff]  ;;  %p1094_p2 = por %p1093_p1, %p1092_p0 }
  0x20   : > { %600 = vperm.xlu1 %1042, %v574_v12  }
  0x21   : > { %635 = vperm.xlu0 %1041, %v581_v14   ;;  %p1095_p3 = pnand %p1094_p2, %p1088_p13 }
  0x22   : > { %984 = vmatmul.mubr.msk.bf16.gmra.mrb[4].mxu0 %vm301_vm0, %v1050_v9 }
  0x23   : > { %992 = vmatmul.mubr.msk.bf16.gmra.mrb[4].mxu1 %vm301_vm0, %v1052_v11 }
  0x24   : > { %605 = vperm.xlu1 %1042, %v575_v15  }
  0x25   : > { %645 = vperm.xlu0 %1041, %v583_v16  }
  0x28   : > { %610 = vperm.xlu1 %1042, %v576_v17  }
  0x29   : > { %655 = vperm.xlu0 %1041, %v585_v18  }
  0x2c   : > { %615 = vperm.xlu1 %1042, %v577_v19  }
  0x30   : > { %620 = vperm.xlu1 %1042, %v578_v20  }
  0x34   : > { %625 = vperm.xlu1 %1042, %v579_v21  }
  0x38   : > { %630 = vperm.xlu1 %1042, %v580_v22  }
  0x3c   : > { %640 = vperm.xlu1 %1042, %v582_v23  }
  0x40   : > { %650 = vperm.xlu1 %1042, %v584_v24  }
  0xed   : > { %v981_v28 = vpop.f32.mrb[0].mxu0 }
  0xee   : > { %v1269_v29 = vadd.f32 %v981_v28, %v1266_v27  ;;  %v989_v30 = vpop.f32.mrb[0].mxu1  ;;  %v360_v31 = vpop.f32.mrb[1].mxu0 }
  0xef   : > { %v1272_v32 = vadd.f32 %v989_v30, %v1266_v27  ;;  %v1275_v33 = vadd.f32 %v1266_v27, %v360_v31  ;;  %v392_v34 = vpop.f32.mrb[1].mxu1  ;;  %v982_v35 = vpop.f32.mrb[2].mxu0  ;;  %v586_v30 = vld [vmem:[%s1243_s13 + $0x70] sm:$0xff]  ;;  %v587_v31 = vld [vmem:[%s1243_s13 + $0x78] sm:$0xff] }
  0xf0   : > { %v1282_v37 = vadd.f32 %v982_v35, %v1266_v27  ;;  %v990_v38 = vpop.f32.mrb[2].mxu1  ;;  %v363_v39 = vpop.f32.mrb[3].mxu0  ;;  %v430_v40 = vmul.f32 %v1269_v29, %v1269_v29  ;;  %v1296_v46 = vadd.f32 %v1266_v27, %v392_v34 }
  0xf1   : > { %v395_v41 = vpop.f32.mrb[3].mxu1  ;;  %v438_v42 = vmul.f32 %v1272_v32, %v1272_v32  ;;  %v1289_v43 = vadd.f32 %v990_v38, %v1266_v27  ;;  %v428_v48 = vmul.f32 %v1275_v33, %v1275_v33  ;;  %v1310_v55 = vadd.f32 %v1266_v27, %v363_v39  ;;  %v1386_v34 = vpop.permute.xlu1 %595 }
  0xf2   : > { %v446_v44 = vsel %vm1277_vm3, %v430_v40, 0.0  ;;  %v431_v45 = vmul.f32 %v1282_v37, %v1282_v37  ;;  %v1303_v50 = vadd.f32 %v1266_v27, %v395_v41  ;;  %v436_v58 = vmul.f32 %v1296_v46, %v1296_v46 }
  0xf3   : > { %v454_v47 = vsel %vm1277_vm3, %v438_v42, 0.0  ;;  %464 = vadd.xlane.f32.xlu1 %v446_v44  ;;  %v439_v53 = vmul.f32 %v1289_v43, %v1289_v43  ;;  %v444_v56 = vsel %vm1277_vm3, %v428_v48, 0.0  ;;  %v429_v4 = vmul.f32 %v1310_v55, %v1310_v55  ;;  %v1400_v44 = vpop.permute.xlu0 %590 }
  0xf4   : > { %480 = vadd.xlane.f32.xlu0 %v454_v47  ;;  %v447_v51 = vsel %vm1277_vm3, %v431_v45, 0.0  ;;  %v437_v1 = vmul.f32 %v1303_v50, %v1303_v50  ;;  %v452_v3 = vsel %vm1277_vm3, %v436_v58, 0.0 }
  0xf5   : > { %v985_v49 = vpop.f32.mrb[4].mxu0  ;;  %v455_v0 = vsel %vm1277_vm3, %v439_v53, 0.0  ;;  %v445_v9 = vsel %vm1277_vm3, %v429_v4, 0.0  ;;  %v1388_v35 = vpop.permute.xlu1 %600 }
  0xf6   : > { %v376_v52 = vpop.f32.mrb[5].mxu0  ;;  %v993_v54 = vpop.f32.mrb[4].mxu1  ;;  %v1324_v2 = vadd.f32 %v985_v49, %v1266_v27  ;;  %v453_v6 = vsel %vm1277_vm3, %v437_v1, 0.0 }
  0xf7   : > { %466 = vadd.xlane.f32.xlu1 %v447_v51  ;;  %v986_v57 = vpop.f32.mrb[6].mxu0  ;;  %v408_v59 = vpop.f32.mrb[5].mxu1  ;;  %v1338_v8 = vadd.f32 %v993_v54, %v1266_v27  ;;  %v1352_v14 = vadd.f32 %v1266_v27, %v376_v52 }
  0xf8   : > { %460 = vadd.xlane.f32.xlu0 %v444_v56  ;;  %v379_v60 = vpop.f32.mrb[7].mxu0  ;;  %v994_v61 = vpop.f32.mrb[6].mxu1  ;;  %v1317_v63 = vadd.f32 %v986_v57, %v1266_v27  ;;  %v434_v10 = vmul.f32 %v1324_v2, %v1324_v2  ;;  %v1366_v20 = vadd.f32 %v1266_v27, %v408_v59 }
  0xf9   : > { %v411_v62 = vpop.f32.mrb[7].mxu1  ;;  %v1331_v5 = vadd.f32 %v994_v61, %v1266_v27  ;;  %v1345_v11 = vadd.f32 %v1266_v27, %v379_v60  ;;  %v442_v16 = vmul.f32 %v1338_v8, %v1338_v8  ;;  %v432_v22 = vmul.f32 %v1352_v14, %v1352_v14  ;;  %v1390_v38 = vpop.permute.xlu1 %605 }
  0xfa   : > { %v435_v7 = vmul.f32 %v1317_v63, %v1317_v63  ;;  %v450_v15 = vsel %vm1277_vm3, %v434_v10, 0.0  ;;  %v1359_v17 = vadd.f32 %v1266_v27, %v411_v62  ;;  %v440_v26 = vmul.f32 %v1366_v20, %v1366_v20  ;;  %v1404_v47 = vpop.permute.xlu0 %635 }
  0xfb   : > { %482 = vadd.xlane.f32.xlu1 %v455_v0  ;;  %v443_v13 = vmul.f32 %v1331_v5, %v1331_v5  ;;  %v433_v19 = vmul.f32 %v1345_v11, %v1345_v11  ;;  %v458_v21 = vsel %vm1277_vm3, %v442_v16, 0.0  ;;  %v448_v25 = vsel %vm1277_vm3, %v432_v22, 0.0 }
  0xfc   : > { %476 = vadd.xlane.f32.xlu0 %v452_v3  ;;  %v451_v12 = vsel %vm1277_vm3, %v435_v7, 0.0  ;;  %v441_v24 = vmul.f32 %v1359_v17, %v1359_v17  ;;  %v456_v28 = vsel %vm1277_vm3, %v440_v26, 0.0 }
  0xfd   : > { %v459_v18 = vsel %vm1277_vm3, %v443_v13, 0.0  ;;  %v449_v23 = vsel %vm1277_vm3, %v433_v19, 0.0  ;;  %v1392_v39 = vpop.permute.xlu1 %610 }
  0xfe   : > { %v457_v27 = vsel %vm1277_vm3, %v441_v24, 0.0  ;;  %v1408_v49 = vpop.permute.xlu0 %645 }
  0xff   : > { %478 = vadd.xlane.f32.xlu1 %v453_v6 }
 0x100   : > { %462 = vadd.xlane.f32.xlu0 %v445_v9 }
 0x101   : > { %v1394_v40 = vpop.permute.xlu1 %615 }
 0x102   : > { %v1412_v52 = vpop.permute.xlu0 %655 }
 0x103   : > { %474 = vadd.xlane.f32.xlu1 %v451_v12 }
 0x104   : > { %472 = vadd.xlane.f32.xlu0 %v450_v15 }
 0x105   : > { %v1396_v41 = vpop.permute.xlu1 %620 }
 0x107   : > { %490 = vadd.xlane.f32.xlu1 %v459_v18 }
 0x108   : > { %488 = vadd.xlane.f32.xlu0 %v458_v21 }
 0x109   : > { %v1398_v42 = vpop.permute.xlu1 %625 }
 0x10b   : > { %470 = vadd.xlane.f32.xlu1 %v449_v23 }
 0x10c   : > { %468 = vadd.xlane.f32.xlu0 %v448_v25 }
 0x10d   : > { %v1402_v45 = vpop.permute.xlu1 %630 }
 0x10f   : > { %486 = vadd.xlane.f32.xlu1 %v457_v27 }
 0x110   : > { %484 = vadd.xlane.f32.xlu0 %v456_v28 }
 0x111   : > { %v1406_v48 = vpop.permute.xlu1 %640 }
 0x115   : > { %v1410_v51 = vpop.permute.xlu1 %650 }
 0x120   : > { %660 = vperm.xlu1 %1042, %v586_v30  }
 0x126   : > { %665 = vperm.xlu0 %1041, %v587_v31  }
 0x180   : > { %v465_v53 = vpop.xlane.xlu1 %464 }
 0x181   : > { %v481_v54 = vpop.xlane.xlu0 %480  ;;  %v494_v56 = vmax.f32 %v465_v53, 1e-24 }
 0x182   : > { %v502_v57 = vmax.f32 %v481_v54, 1e-24 }
 0x183   : > { %1053 = vrsqrt.f32 %v494_v56 }
 0x184   : > { %1055 = vrsqrt.f32 %v502_v57  ;;  %v467_v58 = vpop.xlane.xlu1 %466 }
 0x185   : > { %v495_v59 = vmax.f32 %v467_v58, 1e-24  ;;  %v461_v60 = vpop.xlane.xlu0 %460 }
 0x186   : > { %v492_v61 = vmax.f32 %v461_v60, 1e-24 }
 0x187   : > { %1057 = vrsqrt.f32 %v495_v59 }
 0x188   : > { %1059 = vrsqrt.f32 %v492_v61  ;;  %v483_v62 = vpop.xlane.xlu1 %482 }
 0x189   : > { %v503_v0 = vmax.f32 %v483_v62, 1e-24  ;;  %v477_v1 = vpop.xlane.xlu0 %476 }
 0x18a   : > { %v500_v3 = vmax.f32 %v477_v1, 1e-24 }
 0x18b   : > { %1061 = vrsqrt.f32 %v503_v0 }
 0x18c   : > { %1063 = vrsqrt.f32 %v500_v3  ;;  %v479_v4 = vpop.xlane.xlu1 %478 }
 0x18d   : > { %v1054_v6 = vpop.eup %1053  ;;  %v501_v7 = vmax.f32 %v479_v4, 1e-24  ;;  %v463_v9 = vpop.xlane.xlu0 %462 }
 0x18e   : > { %v1056_v10 = vpop.eup %1055  ;;  %v526_v12 = vmul.f32 1.8, %v1054_v6  ;;  %v493_v13 = vmax.f32 %v463_v9, 1e-24 }
 0x18f   : > { %v534_v15 = vmul.f32 1.8, %v1056_v10  ;;  %1065 = vrsqrt.f32 %v501_v7 }
 0x190   : > { %v542_v16 = vmul.f32 %v526_v12, %v1269_v29  ;;  %1067 = vrsqrt.f32 %v493_v13  ;;  %v475_v18 = vpop.xlane.xlu1 %474 }
 0x191   : > { %v1058_v19 = vpop.eup %1057  ;;  %v499_v21 = vmax.f32 %v475_v18, 1e-24  ;;  %v473_v22 = vpop.xlane.xlu0 %472  ;;  %v550_v24 = vmul.f32 %v534_v15, %v1272_v32 }
 0x192   : > { %v1060_v23 = vpop.eup %1059  ;;  %v527_v25 = vmul.f32 1.8, %v1058_v19  ;;  %v498_v26 = vmax.f32 %v473_v22, 1e-24  ;;  %v558_v27 = vsel %vm1277_vm3, %v542_v16, %v1269_v29 }
 0x193   : > { %1069 = vrsqrt.f32 %v499_v21  ;;  %v524_v53 = vmul.f32 1.8, %v1060_v23  ;;  %v566_v58 = vsel %vm1277_vm3, %v550_v24, %v1272_v32  ;;  %v670_v61 = vmul.f32 %v1388_v35, %v558_v27 }
 0x194   : > { %v543_v28 = vmul.f32 %v527_v25, %v1282_v37  ;;  %1071 = vrsqrt.f32 %v498_v26  ;;  %v491_v30 = vpop.xlane.xlu1 %490  ;;  %v678_v12 = vmul.f32 %v1406_v48, %v566_v58 }
 0x195   : > { %v1062_v31 = vpop.eup %1061  ;;  %v507_v54 = vmax.f32 %v491_v30, 1e-24  ;;  %v489_v56 = vpop.xlane.xlu0 %488  ;;  %v540_v32 = vmul.f32 %v524_v53, %v1275_v33 }
 0x196   : > { %v1064_v57 = vpop.eup %1063  ;;  %v559_v59 = vsel %vm1277_vm3, %v543_v28, %v1282_v37  ;;  %v535_v29 = vmul.f32 1.8, %v1062_v31  ;;  %v506_v60 = vmax.f32 %v489_v56, 1e-24 }
 0x197   : > { %v671_v62 = vmul.f32 %v1390_v38, %v559_v59  ;;  %v532_v0 = vmul.f32 1.8, %v1064_v57  ;;  %1073 = vrsqrt.f32 %v507_v54  ;;  %v556_v21 = vsel %vm1277_vm3, %v540_v32, %v1275_v33 }
 0x198   : > { %v551_v1 = vmul.f32 %v535_v29, %v1289_v43  ;;  %1075 = vrsqrt.f32 %v506_v60  ;;  %v471_v3 = vpop.xlane.xlu1 %470  ;;  %v668_v53 = vmul.f32 %v1400_v44, %v556_v21 }
 0x199   : > { %v1066_v4 = vpop.eup %1065  ;;  %v926_v6 = vpack.c.bf16 %v671_v62, %v670_v61  ;;  %v548_v7 = vmul.f32 %v532_v0, %v1296_v46  ;;  %v497_v9 = vmax.f32 %v471_v3, 1e-24  ;;  %v469_v37 = vpop.xlane.xlu0 %468 }
 0x19a   : > { %v1068_v10 = vpop.eup %1067  ;;  %v567_v35 = vsel %vm1277_vm3, %v551_v1, %v1289_v43  ;;  %v533_v38 = vmul.f32 1.8, %v1066_v4  ;;  %v496_v13 = vmax.f32 %v469_v37, 1e-24 }
 0x19b   : > { %958 = vst [vmem:[%s1438_s27 + $0x8] sm:$0xff] %v926_v6   ;;  %v679_v15 = vmul.f32 %v1408_v49, %v567_v35  ;;  %v564_v16 = vsel %vm1277_vm3, %v548_v7, %v1296_v46  ;;  %v525_v18 = vmul.f32 1.8, %v1068_v10  ;;  %1077 = vrsqrt.f32 %v497_v9 }
 0x19c   : > { %v549_v48 = vmul.f32 %v533_v38, %v1303_v50  ;;  %1079 = vrsqrt.f32 %v496_v13  ;;  %v487_v19 = vpop.xlane.xlu1 %486  ;;  %v676_v46 = vmul.f32 %v1402_v45, %v564_v16 }
 0x19d   : > { %v1070_v43 = vpop.eup %1069  ;;  %v946_v22 = vpack.c.bf16 %v679_v15, %v678_v12  ;;  %v541_v23 = vmul.f32 %v525_v18, %v1310_v55  ;;  %v505_v49 = vmax.f32 %v487_v19, 1e-24  ;;  %v485_v24 = vpop.xlane.xlu0 %484 }
 0x19e   : > { %v1072_v25 = vpop.eup %1071  ;;  %v565_v26 = vsel %vm1277_vm3, %v549_v48, %v1303_v50  ;;  %v531_v27 = vmul.f32 1.8, %v1070_v43  ;;  %v504_v28 = vmax.f32 %v485_v24, 1e-24 }
 0x19f   : > { %962 = vst [vmem:[%s1438_s27 + $0x28] sm:$0xff] %v946_v22   ;;  %v677_v30 = vmul.f32 %v1404_v47, %v565_v26  ;;  %v557_v33 = vsel %vm1277_vm3, %v541_v23, %v1310_v55  ;;  %v530_v31 = vmul.f32 1.8, %v1072_v25  ;;  %1081 = vrsqrt.f32 %v505_v49 }
 0x1a0   : > { %v669_v45 = vmul.f32 %v1386_v34, %v557_v33  ;;  %v547_v54 = vmul.f32 %v531_v27, %v1317_v63  ;;  %1083 = vrsqrt.f32 %v504_v28 }
 0x1a1   : > { %v1074_v50 = vpop.eup %1073  ;;  %v941_v56 = vpack.c.bf16 %v677_v30, %v676_v46  ;;  %v546_v57 = vmul.f32 %v530_v31, %v1324_v2 }
 0x1a2   : > { %v1076_v58 = vpop.eup %1075  ;;  %v921_v47 = vpack.c.bf16 %v669_v45, %v668_v53  ;;  %v563_v55 = vsel %vm1277_vm3, %v547_v54, %v1317_v63  ;;  %v539_v59 = vmul.f32 1.8, %v1074_v50 }
 0x1a3   : > { %961 = vst [vmem:[%s1438_s27 + $0x20] sm:$0xff] %v941_v56   ;;  %v675_v29 = vmul.f32 %v1398_v42, %v563_v55  ;;  %v562_v34 = vsel %vm1277_vm3, %v546_v57, %v1324_v2  ;;  %v538_v44 = vmul.f32 1.8, %v1076_v58  ;;  %v661_v2 = vpop.permute.xlu1 %660 }
 0x1a4   : > { %922 = vst [vmem:[%s1438_s27] sm:$0xff] %v921_v47   ;;  %v674_v60 = vmul.f32 %v1396_v41, %v562_v34  ;;  %v555_v61 = vmul.f32 %v539_v59, %v1331_v5 }
 0x1a5   : > { %v1078_v62 = vpop.eup %1077  ;;  %v554_v0 = vmul.f32 %v538_v44, %v1338_v8  ;;  %v666_v4 = vpop.permute.xlu0 %665 }
 0x1a6   : > { %v1080_v1 = vpop.eup %1079  ;;  %v936_v63 = vpack.c.bf16 %v675_v29, %v674_v60  ;;  %v529_v3 = vmul.f32 1.8, %v1078_v62  ;;  %v571_v42 = vsel %vm1277_vm3, %v555_v61, %v1331_v5 }
 0x1a7   : > { %v528_v6 = vmul.f32 1.8, %v1080_v1  ;;  %v570_v32 = vsel %vm1277_vm3, %v554_v0, %v1338_v8  ;;  %v683_v41 = vmul.f32 %v666_v4, %v571_v42 }
 0x1a8   : > { %960 = vst [vmem:[%s1438_s27 + $0x18] sm:$0xff] %v936_v63   ;;  %v545_v7 = vmul.f32 %v529_v3, %v1345_v11  ;;  %v682_v9 = vmul.f32 %v661_v2, %v570_v32 }
 0x1a9   : > { %v1082_v37 = vpop.eup %1081  ;;  %v544_v10 = vmul.f32 %v528_v6, %v1352_v14 }
 0x1aa   : > { %v1084_v12 = vpop.eup %1083  ;;  %v561_v5 = vsel %vm1277_vm3, %v545_v7, %v1345_v11  ;;  %v537_v35 = vmul.f32 1.8, %v1082_v37  ;;  %v956_v38 = vpack.c.bf16 %v683_v41, %v682_v9 }
 0x1ab   : > { %v673_v8 = vmul.f32 %v1394_v40, %v561_v5  ;;  %v560_v13 = vsel %vm1277_vm3, %v544_v10, %v1352_v14  ;;  %v536_v15 = vmul.f32 1.8, %v1084_v12 }
 0x1ac   : > { %v672_v16 = vmul.f32 %v1392_v39, %v560_v13  ;;  %v553_v18 = vmul.f32 %v537_v35, %v1359_v17  ;;  %964 = vst [vmem:[%s1438_s27 + $0x38] sm:$0xff] %v956_v38  }
 0x1ad   : > { %v552_v48 = vmul.f32 %v536_v15, %v1366_v20 }
 0x1ae   : > { %v931_v11 = vpack.c.bf16 %v673_v8, %v672_v16  ;;  %v569_v40 = vsel %vm1277_vm3, %v553_v18, %v1359_v17 }
 0x1af   : > { %v681_v14 = vmul.f32 %v1412_v52, %v569_v40  ;;  %v568_v39 = vsel %vm1277_vm3, %v552_v48, %v1366_v20 }
 0x1b0   : > { %959 = vst [vmem:[%s1438_s27 + $0x10] sm:$0xff] %v931_v11   ;;  %v680_v19 = vmul.f32 %v1410_v51, %v568_v39 }
 0x1b2   : > { %v951_v17 = vpack.c.bf16 %v681_v14, %v680_v19 }
 0x1b4   : > { %963 = vst [vmem:[%s1438_s27 + $0x30] sm:$0xff] %v951_v17  }
 0x1b5   : > { %1098 = shalt.err (!%p1095_p3)
}
 0x1b6   : > { %s1099_s11 = scalar_lea.hbm %s1509_s6, 1024  ;;  %s1103_s14 = scalar_lea.hbm %s1561_s4, 2048 }
 0x1b7   : > { %p1100_p4 = scmp.ne.s32.totalorder %s1509_s6, %s1099_s11  ;;  %p1104_p9 = scmp.lt.u32.totalorder %s1509_s6, %s1561_s4 }
 0x1b8   : > { %p1105_p10 = scmp.lt.u32.totalorder %s1103_s14, %s1099_s11  ;;  %p1107_p12 = scmp.lt.u32.totalorder %s1099_s11, %s1509_s6 }
 0x1b9   : > { %p1101_p7 = pnand %p1100_p4, %p1216_p5 }
 0x1ba   : > { %p1106_p11 = por %p1105_p10, %p1104_p9 }
 0x1bb   : > { %p1102_p8 = pneg %p1101_p7 }
 0x1bc   : > { %p1108_p13 = por %p1107_p12, %p1106_p11 }
 0x1be   : > { %p1109_p0 = pnand %p1108_p13, %p1102_p8 }
 0x1c0   : > { %1112 = shalt.err (!%p1109_p0)
}
 0x1c1   : > { %s1151_s23 = smov 64   ;;  %s1152_s27 = smov 4  }
 0x1c2   : > { %999 = dma.vmem_to_hbm [thread:$0]  (%p1216_p5), %s1511_s29, 1024, %s1509_s6, %s1516_s19, %s1151_s23, %s1151_s23, %s1152_s27  }
 0x1c3 PF: > { %p1005_p1 = scmp.ge.s32.totalorder %s1147_s18, 2  ;;  %s793_s28 = sand.u32 1, %s1135_s15  }
 0x1c4   : > { %s794_s30 = scalar_lea.sflag [#allocation3], %s793_s28 }
 0x1c5   : > { %p1002_p2 = pnand %p1005_p1, %p1220_p6 }
 0x1c7   : > { %1130 = dma.done.wait (!%p1002_p2), %s794_s30, 1024  }
 0x1c8   : > { %1132 = vsyncadd (!%p1002_p2), %s794_s30, 4294966272  ;;  %p14_p3 = scmp.ge.s32.totalorder %s1203_s21, 4   ;;  %s1566_s15 = smov %s1139_s16 }
 0x1c9   : > { %s1567_s16 = smov %s1143_s17  ;;  %s1568_s17 = smov %s1214_s24 }
 0x1ca   : > { %s1569_s18 = smov %s1203_s21  ;;  %16 = sbr.rel (!%p14_p3) target bundleno = 3 (0x3), region = 74 }
 0x1d1   :  { %799 = vsyncpa [#allocation3], 1 }
 0x1d2   :  { %801 = vsyncpa [#allocation3 + $0x1], 1 }

</bundles_post_ra>
